<compile_context>
chip_gen: v5e
topology: v5e:2x2
jax: 0.10.0
libtpu: 0.0.40
codegen_flags: <defaults>
</compile_context>

<pallas_src>
import jax
import jax.numpy as jnp
from jax.experimental import pallas as pl
from jax.experimental.pallas import tpu as pltpu

# ---- module hyper-params (consistent with the PyTorch __init__) ----
INPUT_SIZE = 32
START_HIDDEN = 8
BEFORE_HIDDEN_LAYERS = 2
NUM_COLOR_GROUPS = 4          # LabelsLayersData.num_color_groups
GROUPS_PAD = 8                # one-hot padded to 8 rows (sublane multiple)
EMBED_DIM = 16                # LabelsLayersData.embedding_dim_color_groups
LEAKY_SLOPE = 0.2
IN_EPS = 1e-5


def discriminator_sizes(input_size, start_hidden_size, before_hidden_layers_count):
    sizes = [1] + [start_hidden_size * 2 ** n
                   for n in range(before_hidden_layers_count + 1)]
    sizes = sizes + [input_size + EMBED_DIM]
    sizes.reverse()
    return sizes  # e.g. [48, 32, 16, 8, 1]


def _round_up(x, m):
    return (x + m - 1) // m * m


def _inorm_lrelu(h):
    """InstanceNorm1d (per sample over features, axis 0 here) + LeakyReLU(0.2)."""
    mean = jnp.mean(h, axis=0, keepdims=True)
    diff = h - mean
    var = jnp.mean(diff * diff, axis=0, keepdims=True)   # biased variance
    h = diff * jax.lax.rsqrt(var + IN_EPS)
    return jnp.where(h >= 0, h, LEAKY_SLOPE * h)


def make_discriminator_kernel(hidden_sizes, num_layers):
    """Transposed fused MLP kernel.

    Refs:
      x_ref   : (INPUT_SIZE, TILE_B)   f32   transposed input features
      idx_ref : (1, TILE_B)            int32 color-group index per sample
      w_ref   : (num_layers + 2, S, S) f32   packed weight slab:
                  slot 0            -> W0[:INPUT_SIZE, :]^T   (h0, INPUT_SIZE)
                  slot 1            -> W0[INPUT_SIZE:, :]^T   (h0, EMBED_DIM)
                  slot 1+l          -> W_l^T                  (h_l, h_{l-1})
                  slot num_layers   -> W_last (column)        (h_{n-2}, 1)
                  slot num_layers+1 -> emb_table^T            (EMBED_DIM, 4)
      b_ref   : (num_layers, S, 1)     f32   bias column vectors
      o_ref   : (1, TILE_B)            f32   lane-dense output
    """

    def kernel(x_ref, idx_ref, w_ref, b_ref, o_ref):
        f32 = jnp.float32
        tile_b = x_ref.shape[-1]

        # ---- fused embedding lookup: table^T @ one_hot(idx) -> (EMBED_DIM, T)
        idx = idx_ref[...]                                            # (1, T) i32
        groups = jax.lax.broadcasted_iota(jnp.int32, (GROUPS_PAD, tile_b), 0)
        one_hot = (groups == idx).astype(f32)                         # (8, T)
        table_t = w_ref[num_layers + 1, :EMBED_DIM, :GROUPS_PAD]      # (16, 8)
        emb = jnp.dot(table_t, one_hot, preferred_element_type=f32)   # (16, T)

        # ---- layer 0: split matmul (replaces concat(x, emb) @ W0)
        h0 = hidden_sizes[0]
        h = (jnp.dot(w_ref[0, :h0, :INPUT_SIZE], x_ref[...],
                     preferred_element_type=f32)
             + jnp.dot(w_ref[1, :h0, :EMBED_DIM], emb,
                       preferred_element_type=f32)
             + b_ref[0, :h0, :])
        h = _inorm_lrelu(h)

        # ---- middle layers (fully unrolled, static per-layer shapes)
        for l in range(1, num_layers - 1):
            fin, fout = hidden_sizes[l - 1], hidden_sizes[l]
            h = (jnp.dot(w_ref[l + 1, :fout, :fin], h,
                         preferred_element_type=f32)
                 + b_ref[l, :fout, :])
            h = _inorm_lrelu(h)

        # ---- final layer (out_features == 1): VPU multiply + sublane reduce,
        #      writes a lane-dense (1, TILE_B) slab instead of (TILE_B, 1).
        fin = hidden_sizes[-2]
        w_last = w_ref[num_layers, :fin, :1]                          # (fin, 1)
        b_last = b_ref[num_layers - 1, :1, :]                         # (1, 1)
        out = jnp.sum(h * w_last, axis=0, keepdims=True) + b_last     # (1, T)
        o_ref[...] = out.astype(o_ref.dtype)

    return kernel


def _pad2(a, rows, cols):
    return jnp.pad(a, ((0, rows - a.shape[0]), (0, cols - a.shape[1])))


@jax.jit
def discriminator_forward(x, labels, emb_table, params):
    B = x.shape[0]
    num_layers = len(params)
    hidden_sizes = tuple(int(w.shape[1]) for (w, _) in params)   # (32, 16, 8, 1)
    assert hidden_sizes[-1] == 1
    assert params[0][0].shape[0] == INPUT_SIZE + EMBED_DIM

    # slab side length: covers every packed block, multiple of 8 sublanes.
    S = _round_up(max((INPUT_SIZE, EMBED_DIM, GROUPS_PAD) + hidden_sizes), 8)

    # ---- pack weights (+ embedding table) into one slab; biases into another.
    w0 = params[0][0].astype(jnp.float32)                   # (48, h0), stored (in, out)
    slots = [w0[:INPUT_SIZE, :].T,                           # W0x^T  (h0, 32)
             w0[INPUT_SIZE:, :].T]                           # W0e^T  (h0, 16)
    for l in range(1, num_layers - 1):
        slots.append(params[l][0].astype(jnp.float32).T)     # (h_l, h_{l-1})
    slots.append(params[-1][0].astype(jnp.float32))          # final kept as column (fin, 1)
    slots.append(emb_table.astype(jnp.float32).T)            # (16, 4)
    w_slab = jnp.stack([_pad2(s, S, S) for s in slots])      # (num_layers+2, S, S)

    b_slab = jnp.stack(
        [_pad2(params[l][1].astype(jnp.float32).reshape(-1, 1), S, 1)
         for l in range(num_layers)])                        # (num_layers, S, 1)

    # ---- batch tiling: transposed, lane-dense layout; pad B to a tile multiple.
    TILE_B = 256 if B >= 256 else _round_up(B, 128)
    B_pad = _round_up(B, TILE_B)
    x_t = jnp.pad(x.astype(jnp.float32).T, ((0, 0), (0, B_pad - B)))    # (32, B_pad)
    # round-then-cast (robust against 2.9999999-style float labels)
    idx = jnp.round(labels[:, 2]).astype(jnp.int32).reshape(1, B)
    idx = jnp.pad(idx, ((0, 0), (0, B_pad - B)))                        # (1, B_pad)

    out = pl.pallas_call(
        make_discriminator_kernel(hidden_sizes, num_layers),
        out_shape=jax.ShapeDtypeStruct((1, B_pad), jnp.float32),
        grid_spec=pltpu.PrefetchScalarGridSpec(
            num_scalar_prefetch=0,
            grid=(B_pad // TILE_B,),
            in_specs=[
                pl.BlockSpec((INPUT_SIZE, TILE_B), lambda i: (0, i)),
                pl.BlockSpec((1, TILE_B), lambda i: (0, i)),
                pl.BlockSpec((num_layers + 2, S, S), lambda i: (0, 0, 0)),
                pl.BlockSpec((num_layers, S, 1), lambda i: (0, 0, 0)),
            ],
            out_specs=pl.BlockSpec((1, TILE_B), lambda i: (0, i)),
        ),
        compiler_params=pltpu.CompilerParams(
            dimension_semantics=("parallel",)),
    )(x_t, idx, w_slab, b_slab)

    return out[0, :B].reshape(B, 1)


def init_params(key, sizes):
    """Deterministic Linear params; weights stored as (in, out) = W.T, bias (out,)."""
    params = []
    for n in range(1, len(sizes)):
        fan_in, fan_out = sizes[n - 1], sizes[n]
        key, kw, kb = jax.random.split(key, 3)
        bound = 1.0 / float(fan_in) ** 0.5
        w = jax.random.uniform(kw, (fan_in, fan_out), jnp.float32, -bound, bound)
        b = jax.random.uniform(kb, (fan_out,), jnp.float32, -bound, bound)
        params.append((w, b))
    return params


def discriminator_reference(x, labels, emb_table, params):
    """Pure-JAX reference for correctness checking (original (B, F) layout)."""
    idx = jnp.round(labels[:, 2]).astype(jnp.int32)
    h = jnp.concatenate([x, emb_table[idx]], axis=1)
    n = len(params)
    for i, (w, b) in enumerate(params):
        h = h @ w + b
        if i != n - 1:
            mean = jnp.mean(h, axis=1, keepdims=True)
            var = jnp.mean((h - mean) ** 2, axis=1, keepdims=True)
            h = (h - mean) / jnp.sqrt(var + IN_EPS)
            h = jnp.where(h >= 0, h, LEAKY_SLOPE * h)
    return h


if __name__ == "__main__":
    key = jax.random.PRNGKey(0)
    kx, kl, ke, kp = jax.random.split(key, 4)

    B = 2
    sizes = discriminator_sizes(INPUT_SIZE, START_HIDDEN, BEFORE_HIDDEN_LAYERS)
    # sizes == [48, 32, 16, 8, 1]

    x = jax.random.normal(kx, (B, INPUT_SIZE), jnp.float32)
    color_group = jax.random.randint(kl, (B,), 0, NUM_COLOR_GROUPS)
    labels = jnp.stack(
        [jnp.zeros((B,), jnp.float32),
         jnp.zeros((B,), jnp.float32),
         color_group.astype(jnp.float32)],
        axis=1,
    )  # (B, 3), matches LabelsLayersData.get_labels_list layout
    emb_table = jax.random.normal(ke, (NUM_COLOR_GROUPS, EMBED_DIM), jnp.float32)
    params = init_params(kp, sizes)

    out = discriminator_forward(x, labels, emb_table, params)
    out = jax.block_until_ready(out)

    assert out.shape == (B, 1), out.shape
    ref = discriminator_reference(x, labels, emb_table, params)
    assert jnp.allclose(out, ref, atol=1e-4, rtol=1e-4), (out, ref)

    print("KERNEL_OK")
</pallas_src>

<mosaic_0001>
module attributes {stable_mosaic.version = 11 : i64} {
  func.func @kernel(%arg0: i32, %arg1: memref<32x128xf32, #tpu.memory_space<vmem>>, %arg2: memref<1x128xi32, #tpu.memory_space<vmem>>, %arg3: memref<6x32x32xf32, #tpu.memory_space<vmem>>, %arg4: memref<4x32x1xf32, #tpu.memory_space<vmem>>, %arg5: memref<1x128xf32, #tpu.memory_space<vmem>>) attributes {dimension_semantics = [#tpu.dimension_semantics<parallel>], iteration_bounds = array<i64: 1>, scalar_prefetch = 0 : i64, scratch_operands = 0 : i64, tpu.core_type = #tpu.core_type<tc>, window_params = [{transform_indices = @transform_0, window_bounds = array<i64: 32, 128>}, {transform_indices = @transform_1, window_bounds = array<i64: 1, 128>}, {pipeline_mode = #tpu.pipeline_mode<synchronous>, transform_indices = @transform_2, window_bounds = array<i64: 6, 32, 32>}, {pipeline_mode = #tpu.pipeline_mode<synchronous>, transform_indices = @transform_3, window_bounds = array<i64: 4, 32, 1>}, {transform_indices = @transform_4, window_bounds = array<i64: 1, 128>}]} {
    %c0 = arith.constant 0 : index
    %c0_0 = arith.constant 0 : index
    %0 = vector.load %arg2[%c0, %c0_0] : memref<1x128xi32, #tpu.memory_space<vmem>>, vector<1x128xi32>
    %1 = tpu.iota {dimensions = array<i32: 0>} : vector<8x128xi32>
    %2 = vector.broadcast %0 : vector<1x128xi32> to vector<8x128xi32>
    %3 = arith.cmpi eq, %1, %2 : vector<8x128xi32>
    %4 = arith.extui %3 : vector<8x128xi1> to vector<8x128xi32>
    %5 = arith.sitofp %4 : vector<8x128xi32> to vector<8x128xf32>
    %c5 = arith.constant 5 : index
    %c0_1 = arith.constant 0 : index
    %c0_2 = arith.constant 0 : index
    %6 = vector.load %arg3[%c5, %c0_1, %c0_2] : memref<6x32x32xf32, #tpu.memory_space<vmem>>, vector<1x16x8xf32>
    %7 = vector.shape_cast %6 : vector<1x16x8xf32> to vector<16x8xf32>
    %cst = arith.constant dense<0.000000e+00> : vector<16x128xf32>
    %8 = tpu.matmul %7, %5, %cst {dimension_numbers = #tpu.dot_dimension_numbers<[1], [0], [0], [1], [0, 0, 1, 1], [], []>} : vector<16x8xf32>, vector<8x128xf32>, vector<16x128xf32> -> vector<16x128xf32>
    %c0_3 = arith.constant 0 : index
    %c0_4 = arith.constant 0 : index
    %c0_5 = arith.constant 0 : index
    %9 = vector.load %arg3[%c0_3, %c0_4, %c0_5] : memref<6x32x32xf32, #tpu.memory_space<vmem>>, vector<1x32x32xf32>
    %10 = vector.shape_cast %9 : vector<1x32x32xf32> to vector<32x32xf32>
    %c0_6 = arith.constant 0 : index
    %c0_7 = arith.constant 0 : index
    %11 = vector.load %arg1[%c0_6, %c0_7] : memref<32x128xf32, #tpu.memory_space<vmem>>, vector<32x128xf32>
    %cst_8 = arith.constant dense<0.000000e+00> : vector<32x128xf32>
    %12 = tpu.matmul %10, %11, %cst_8 {dimension_numbers = #tpu.dot_dimension_numbers<[1], [0], [0], [1], [0, 0, 1, 1], [], []>} : vector<32x32xf32>, vector<32x128xf32>, vector<32x128xf32> -> vector<32x128xf32>
    %c1 = arith.constant 1 : index
    %c0_9 = arith.constant 0 : index
    %c0_10 = arith.constant 0 : index
    %13 = vector.load %arg3[%c1, %c0_9, %c0_10] : memref<6x32x32xf32, #tpu.memory_space<vmem>>, vector<1x32x16xf32>
    %14 = vector.shape_cast %13 : vector<1x32x16xf32> to vector<32x16xf32>
    %cst_11 = arith.constant dense<0.000000e+00> : vector<32x128xf32>
    %15 = tpu.matmul %14, %8, %cst_11 {dimension_numbers = #tpu.dot_dimension_numbers<[1], [0], [0], [1], [0, 0, 1, 1], [], []>} : vector<32x16xf32>, vector<16x128xf32>, vector<32x128xf32> -> vector<32x128xf32>
    %16 = arith.addf %12, %15 : vector<32x128xf32>
    %c0_12 = arith.constant 0 : index
    %c0_13 = arith.constant 0 : index
    %c0_14 = arith.constant 0 : index
    %17 = vector.load %arg4[%c0_12, %c0_13, %c0_14] : memref<4x32x1xf32, #tpu.memory_space<vmem>>, vector<1x32x1xf32>
    %18 = vector.shape_cast %17 : vector<1x32x1xf32> to vector<32x1xf32>
    %19 = vector.broadcast %18 : vector<32x1xf32> to vector<32x128xf32>
    %20 = arith.addf %16, %19 : vector<32x128xf32>
    %cst_15 = arith.constant dense<0.000000e+00> : vector<128xf32>
    %21 = vector.multi_reduction <add>, %20, %cst_15 [0] : vector<32x128xf32> to vector<128xf32>
    %22 = vector.shape_cast %21 : vector<128xf32> to vector<1x128xf32>
    %cst_16 = arith.constant 3.200000e+01 : f32
    %23 = vector.broadcast %cst_16 : f32 to vector<1x128xf32>
    %24 = arith.divf %22, %23 : vector<1x128xf32>
    %25 = vector.broadcast %24 : vector<1x128xf32> to vector<32x128xf32>
    %26 = arith.subf %20, %25 : vector<32x128xf32>
    %27 = arith.mulf %26, %26 : vector<32x128xf32>
    %cst_17 = arith.constant dense<0.000000e+00> : vector<128xf32>
    %28 = vector.multi_reduction <add>, %27, %cst_17 [0] : vector<32x128xf32> to vector<128xf32>
    %29 = vector.shape_cast %28 : vector<128xf32> to vector<1x128xf32>
    %cst_18 = arith.constant 3.200000e+01 : f32
    %30 = vector.broadcast %cst_18 : f32 to vector<1x128xf32>
    %31 = arith.divf %29, %30 : vector<1x128xf32>
    %cst_19 = arith.constant 9.99999974E-6 : f32
    %32 = vector.broadcast %cst_19 : f32 to vector<1x128xf32>
    %33 = arith.addf %31, %32 : vector<1x128xf32>
    %34 = math.rsqrt %33 : vector<1x128xf32>
    %35 = vector.broadcast %34 : vector<1x128xf32> to vector<32x128xf32>
    %36 = arith.mulf %26, %35 : vector<32x128xf32>
    %cst_20 = arith.constant 0.000000e+00 : f32
    %37 = vector.broadcast %cst_20 : f32 to vector<32x128xf32>
    %38 = arith.cmpf oge, %36, %37 : vector<32x128xf32>
    %cst_21 = arith.constant 2.000000e-01 : f32
    %39 = vector.broadcast %cst_21 : f32 to vector<32x128xf32>
    %40 = arith.mulf %39, %36 : vector<32x128xf32>
    %41 = arith.select %38, %36, %40 : vector<32x128xi1>, vector<32x128xf32>
    %c2 = arith.constant 2 : index
    %c0_22 = arith.constant 0 : index
    %c0_23 = arith.constant 0 : index
    %42 = vector.load %arg3[%c2, %c0_22, %c0_23] : memref<6x32x32xf32, #tpu.memory_space<vmem>>, vector<1x16x32xf32>
    %43 = vector.shape_cast %42 : vector<1x16x32xf32> to vector<16x32xf32>
    %cst_24 = arith.constant dense<0.000000e+00> : vector<16x128xf32>
    %44 = tpu.matmul %43, %41, %cst_24 {dimension_numbers = #tpu.dot_dimension_numbers<[1], [0], [0], [1], [0, 0, 1, 1], [], []>} : vector<16x32xf32>, vector<32x128xf32>, vector<16x128xf32> -> vector<16x128xf32>
    %c1_25 = arith.constant 1 : index
    %c0_26 = arith.constant 0 : index
    %c0_27 = arith.constant 0 : index
    %45 = vector.load %arg4[%c1_25, %c0_26, %c0_27] : memref<4x32x1xf32, #tpu.memory_space<vmem>>, vector<1x16x1xf32>
    %46 = vector.shape_cast %45 : vector<1x16x1xf32> to vector<16x1xf32>
    %47 = vector.broadcast %46 : vector<16x1xf32> to vector<16x128xf32>
    %48 = arith.addf %44, %47 : vector<16x128xf32>
    %cst_28 = arith.constant dense<0.000000e+00> : vector<128xf32>
    %49 = vector.multi_reduction <add>, %48, %cst_28 [0] : vector<16x128xf32> to vector<128xf32>
    %50 = vector.shape_cast %49 : vector<128xf32> to vector<1x128xf32>
    %cst_29 = arith.constant 1.600000e+01 : f32
    %51 = vector.broadcast %cst_29 : f32 to vector<1x128xf32>
    %52 = arith.divf %50, %51 : vector<1x128xf32>
    %53 = vector.broadcast %52 : vector<1x128xf32> to vector<16x128xf32>
    %54 = arith.subf %48, %53 : vector<16x128xf32>
    %55 = arith.mulf %54, %54 : vector<16x128xf32>
    %cst_30 = arith.constant dense<0.000000e+00> : vector<128xf32>
    %56 = vector.multi_reduction <add>, %55, %cst_30 [0] : vector<16x128xf32> to vector<128xf32>
    %57 = vector.shape_cast %56 : vector<128xf32> to vector<1x128xf32>
    %cst_31 = arith.constant 1.600000e+01 : f32
    %58 = vector.broadcast %cst_31 : f32 to vector<1x128xf32>
    %59 = arith.divf %57, %58 : vector<1x128xf32>
    %cst_32 = arith.constant 9.99999974E-6 : f32
    %60 = vector.broadcast %cst_32 : f32 to vector<1x128xf32>
    %61 = arith.addf %59, %60 : vector<1x128xf32>
    %62 = math.rsqrt %61 : vector<1x128xf32>
    %63 = vector.broadcast %62 : vector<1x128xf32> to vector<16x128xf32>
    %64 = arith.mulf %54, %63 : vector<16x128xf32>
    %cst_33 = arith.constant 0.000000e+00 : f32
    %65 = vector.broadcast %cst_33 : f32 to vector<16x128xf32>
    %66 = arith.cmpf oge, %64, %65 : vector<16x128xf32>
    %cst_34 = arith.constant 2.000000e-01 : f32
    %67 = vector.broadcast %cst_34 : f32 to vector<16x128xf32>
    %68 = arith.mulf %67, %64 : vector<16x128xf32>
    %69 = arith.select %66, %64, %68 : vector<16x128xi1>, vector<16x128xf32>
    %c3 = arith.constant 3 : index
    %c0_35 = arith.constant 0 : index
    %c0_36 = arith.constant 0 : index
    %70 = vector.load %arg3[%c3, %c0_35, %c0_36] : memref<6x32x32xf32, #tpu.memory_space<vmem>>, vector<1x8x16xf32>
    %71 = vector.shape_cast %70 : vector<1x8x16xf32> to vector<8x16xf32>
    %cst_37 = arith.constant dense<0.000000e+00> : vector<8x128xf32>
    %72 = tpu.matmul %71, %69, %cst_37 {dimension_numbers = #tpu.dot_dimension_numbers<[1], [0], [0], [1], [0, 0, 1, 1], [], []>} : vector<8x16xf32>, vector<16x128xf32>, vector<8x128xf32> -> vector<8x128xf32>
    %c2_38 = arith.constant 2 : index
    %c0_39 = arith.constant 0 : index
    %c0_40 = arith.constant 0 : index
    %73 = vector.load %arg4[%c2_38, %c0_39, %c0_40] : memref<4x32x1xf32, #tpu.memory_space<vmem>>, vector<1x8x1xf32>
    %74 = vector.shape_cast %73 : vector<1x8x1xf32> to vector<8x1xf32>
    %75 = vector.broadcast %74 : vector<8x1xf32> to vector<8x128xf32>
    %76 = arith.addf %72, %75 : vector<8x128xf32>
    %cst_41 = arith.constant dense<0.000000e+00> : vector<128xf32>
    %77 = vector.multi_reduction <add>, %76, %cst_41 [0] : vector<8x128xf32> to vector<128xf32>
    %78 = vector.shape_cast %77 : vector<128xf32> to vector<1x128xf32>
    %cst_42 = arith.constant 8.000000e+00 : f32
    %79 = vector.broadcast %cst_42 : f32 to vector<1x128xf32>
    %80 = arith.divf %78, %79 : vector<1x128xf32>
    %81 = vector.broadcast %80 : vector<1x128xf32> to vector<8x128xf32>
    %82 = arith.subf %76, %81 : vector<8x128xf32>
    %83 = arith.mulf %82, %82 : vector<8x128xf32>
    %cst_43 = arith.constant dense<0.000000e+00> : vector<128xf32>
    %84 = vector.multi_reduction <add>, %83, %cst_43 [0] : vector<8x128xf32> to vector<128xf32>
    %85 = vector.shape_cast %84 : vector<128xf32> to vector<1x128xf32>
    %cst_44 = arith.constant 8.000000e+00 : f32
    %86 = vector.broadcast %cst_44 : f32 to vector<1x128xf32>
    %87 = arith.divf %85, %86 : vector<1x128xf32>
    %cst_45 = arith.constant 9.99999974E-6 : f32
    %88 = vector.broadcast %cst_45 : f32 to vector<1x128xf32>
    %89 = arith.addf %87, %88 : vector<1x128xf32>
    %90 = math.rsqrt %89 : vector<1x128xf32>
    %91 = vector.broadcast %90 : vector<1x128xf32> to vector<8x128xf32>
    %92 = arith.mulf %82, %91 : vector<8x128xf32>
    %cst_46 = arith.constant 0.000000e+00 : f32
    %93 = vector.broadcast %cst_46 : f32 to vector<8x128xf32>
    %94 = arith.cmpf oge, %92, %93 : vector<8x128xf32>
    %cst_47 = arith.constant 2.000000e-01 : f32
    %95 = vector.broadcast %cst_47 : f32 to vector<8x128xf32>
    %96 = arith.mulf %95, %92 : vector<8x128xf32>
    %97 = arith.select %94, %92, %96 : vector<8x128xi1>, vector<8x128xf32>
    %c4 = arith.constant 4 : index
    %c0_48 = arith.constant 0 : index
    %c0_49 = arith.constant 0 : index
    %98 = vector.load %arg3[%c4, %c0_48, %c0_49] : memref<6x32x32xf32, #tpu.memory_space<vmem>>, vector<1x8x1xf32>
    %99 = vector.shape_cast %98 : vector<1x8x1xf32> to vector<8x1xf32>
    %c3_50 = arith.constant 3 : index
    %c0_51 = arith.constant 0 : index
    %c0_52 = arith.constant 0 : index
    %100 = vector.load %arg4[%c3_50, %c0_51, %c0_52] : memref<4x32x1xf32, #tpu.memory_space<vmem>>, vector<1x1x1xf32>
    %101 = vector.shape_cast %100 : vector<1x1x1xf32> to vector<1x1xf32>
    %102 = vector.broadcast %99 : vector<8x1xf32> to vector<8x128xf32>
    %103 = arith.mulf %97, %102 : vector<8x128xf32>
    %cst_53 = arith.constant dense<0.000000e+00> : vector<128xf32>
    %104 = vector.multi_reduction <add>, %103, %cst_53 [0] : vector<8x128xf32> to vector<128xf32>
    %105 = vector.shape_cast %104 : vector<128xf32> to vector<1x128xf32>
    %106 = vector.broadcast %101 : vector<1x1xf32> to vector<1x128xf32>
    %107 = arith.addf %105, %106 : vector<1x128xf32>
    %c0_54 = arith.constant 0 : index
    %c0_55 = arith.constant 0 : index
    %108 = vector.load %arg5[%c0_54, %c0_55] : memref<1x128xf32, #tpu.memory_space<vmem>>, vector<1x128xf32>
    tpu.vector_store %arg5[%c0_54, %c0_55], %107 {strides = array<i32>} : memref<1x128xf32, #tpu.memory_space<vmem>>, vector<1x128xf32>,
    return
  }
  func.func @transform_0(%arg0: i32) -> (i32, i32) {
    %c0_i32 = arith.constant 0 : i32
    %c0_i32_0 = arith.constant 0 : i32
    return %c0_i32, %arg0 : i32, i32
  }
  func.func @transform_1(%arg0: i32) -> (i32, i32) {
    %c0_i32 = arith.constant 0 : i32
    %c0_i32_0 = arith.constant 0 : i32
    return %c0_i32, %arg0 : i32, i32
  }
  func.func @transform_2(%arg0: i32) -> (i32, i32, i32) {
    %c0_i32 = arith.constant 0 : i32
    %c0_i32_0 = arith.constant 0 : i32
    %c0_i32_1 = arith.constant 0 : i32
    %c0_i32_2 = arith.constant 0 : i32
    return %c0_i32, %c0_i32_0, %c0_i32_1 : i32, i32, i32
  }
  func.func @transform_3(%arg0: i32) -> (i32, i32, i32) {
    %c0_i32 = arith.constant 0 : i32
    %c0_i32_0 = arith.constant 0 : i32
    %c0_i32_1 = arith.constant 0 : i32
    %c0_i32_2 = arith.constant 0 : i32
    return %c0_i32, %c0_i32_0, %c0_i32_1 : i32, i32, i32
  }
  func.func @transform_4(%arg0: i32) -> (i32, i32) {
    %c0_i32 = arith.constant 0 : i32
    %c0_i32_0 = arith.constant 0 : i32
    return %c0_i32, %arg0 : i32, i32
  }
}

</mosaic_0001>

<bundles_post_ra>
// kernel: discriminator_forward.1
= control target key start
LH: loop header
LB: loop body
LE: loop exit
PB: predicated region body
PF: predicated region fallthrough
CT: control target
= control target key end

     0   :  { %v18_v0 = vlaneseq  ;;  %vm27_vm0 = vcmask 64512   ;;  %v486_v5 = vmov 1.0   ;;  %vm112_vm2 = vcmask 261120   ;;  %s611_s1 = inlined_call_operand.vmem [shape: s32[1,128], index: 1, kind: input, shape index: {}]   ;;  %s612_s2 = inlined_call_operand.vmem [shape: f32[6,32,32], index: 2, kind: input, shape index: {}]   ;;  %s613_s0 = inlined_call_operand.vmem [shape: f32[32,128], index: 0, kind: input, shape index: {}]   ;;  %s614_s3 = inlined_call_operand.vmem [shape: f32[4,32,1], index: 3, kind: input, shape index: {}]   ;;  %s615_s4 = inlined_call_operand.vmem [shape: f32[1,128], index: 4, kind: output, shape index: {}]  }
   0x1   :  { %v473_v1 = vld [vmem:[%s611_s1] ss:$0 sm:$0xff]  ;;  %v64_v3 = vld [vmem:[%s613_s0 + $0x18] sm:$0xff]  ;;  %v434_v6 = vld [vmem:[%s612_s2 + $0xa8] sm:$0xff]  ;;  %v487_v12 = vmov 0   ;;  %vm70_vm3 = vcmask 130048  }
   0x2   :  { %v19_v2 = vshrl.u32 %v18_v0, 7  ;;  %v433_v4 = vld [vmem:[%s612_s2 + $0xa0] sm:$0xff]  ;;  %137 = vmatpush.msra.mxu2 %v64_v3  ;;  %461 = vmatpush.msra.mxu3 %v64_v3  ;;  %v63_v7 = vld [vmem:[%s613_s0 + $0x10] sm:$0xff]  ;;  %v62_v8 = vld [vmem:[%s613_s0 + $0x8] sm:$0xff]  ;;  %v488_v33 = vmov 32.0  }
   0x3   :  { %v61_v9 = vld [vmem:[%s613_s0] sm:$0xff]  ;;  %v58_v11 = vld [vmem:[%s612_s2 + $0x8] sm:$0xff]  ;;  %470 = vset.pattern.permute.xlu0 %v487_v12  ;;  %471 = vset.pattern.permute.xlu1 %v487_v12  ;;  %v59_v14 = vld [vmem:[%s612_s2 + $0x10] sm:$0xff]  ;;  %474 = vrcp.f32 %v488_v33 }
   0x4   :  { %vm21_vm1 = vcmp.eq.s32.totalorder %v19_v2, %v473_v1  ;;  %138 = vmatpush.msra.mxu2 %v63_v7  ;;  %462 = vmatpush.msra.mxu3 %v63_v7  ;;  %v57_v10 = vld [vmem:[%s612_s2] sm:$0xff]  ;;  %v156_v15 = vld [vmem:[%s614_s3 + $0x10] sm:$0xff]  ;;  %v155_v16 = vld [vmem:[%s614_s3 + $0x8] sm:$0xff] }
   0x5   :  { %435 = vmatpush.msk.msra.mxu0 %vm21_vm1, %v486_v5  ;;  %472 = vset.pattern.permute.xlu2 %v487_v12  ;;  %v154_v13 = vld [vmem:[%s614_s3] sm:$0xff]  ;;  %v60_v17 = vld [vmem:[%s612_s2 + $0x18] sm:$0xff]  ;;  %v439_v24 = vld [vmem:[%s612_s2 + $0x28] sm:$0xff] }
   0x6   :  { %436 = vmatmul.msk.f32.vlgmr.msra.gmra.mxu0 %vm27_vm0, %v433_v4  ;;  %139 = vmatpush.msra.mxu2 %v62_v8  ;;  %v157_v18 = vld [vmem:[%s614_s3 + $0x18] sm:$0xff]  ;;  %v457_v20 = vld [vmem:[%s614_s3 + $0x40] sm:$0xff]  ;;  %v440_v25 = vld [vmem:[%s612_s2 + $0x30] sm:$0xff] }
   0x7   :  { %463 = vmatpush.msra.mxu3 %v62_v8  ;;  %160 = vperm.xlu0 %470, %v154_v13   ;;  %v459_v21 = vld [vmem:[%s612_s2 + $0x80] sm:$0xff]  ;;  %v441_v26 = vld [vmem:[%s612_s2 + $0x38] sm:$0xff] }
   0x8   :  { %140 = vmatpush.msra.mxu2 %v61_v9  ;;  %170 = vperm.xlu1 %471, %v156_v15   ;;  %v438_v23 = vld [vmem:[%s612_s2 + $0x20] sm:$0xff] }
   0x9   :  { %464 = vmatpush.msra.mxu3 %v61_v9  ;;  %446 = vmatmul.msk.f32.vlgmr.msra.gmra.mxu2 %vm112_vm2, %v57_v10  ;;  %v475_v40 = vpop.eup %474 }
   0xa   :  { %449 = vmatmul.msk.f32.vlgmr.msra.gmra.mxu3 %vm112_vm2, %v60_v17  ;;  %v192_v46 = vmul.f32 32.0, %v475_v40  ;;  %vm196_vm4 = vweird.f32 %v475_v40 }
   0xc   :  { %v193_v52 = vsub.f32 1.0, %v192_v46 }
   0xe   :  { %437 = vmatmul.msk.f32.gmra.mxu0 %vm27_vm0, %v434_v6  ;;  %v194_v55 = vmul.f32 %v475_v40, %v193_v52 }
   0xf   :  { %165 = vperm.xlu0 %470, %v155_v16  }
  0x10   :  { %175 = vperm.xlu1 %471, %v157_v18   ;;  %v195_v58 = vadd.f32 %v475_v40, %v194_v55 }
  0x11   :  { %447 = vmatmul.msk.f32.gmra.mxu2 %vm112_vm2, %v58_v11 }
  0x12   :  { %v197_v61 = vsel %vm196_vm4, %v475_v40, %v195_v58  ;;  %v450_v40 = vld [vmem:[%s612_s2 + $0x40] sm:$0xff] }
  0x17   :  { %341 = vperm.xlu0 %470, %v457_v20   ;;  %v452_v20 = vld [vmem:[%s614_s3 + $0x20] sm:$0xff] }
  0x18   :  { %411 = vperm.xlu1 %471, %v459_v21   ;;  %252 = vperm.xlu2 %472, %v452_v20  }
  0x19   :  { %448 = vmatmul.msk.f32.gmra.mxu2 %vm112_vm2, %v59_v14 }
  0x79   :  { %v161_v31 = vpop.permute.xlu0 %160 }
  0x7a   :  { %v171_v32 = vpop.permute.xlu1 %170 }
  0x81   :  { %v166_v39 = vpop.permute.xlu0 %165 }
  0x82   :  { %v176_v49 = vpop.permute.xlu1 %175 }
  0x83   :  { %v51_v19 = vpop.f32.mrf.mxu0 }
  0x8b   :  { %v54_v22 = vpop.f32.mrf.mxu0 }
  0x8c   :  { %97 = vmatpush.msra.mxu1 %v54_v22  ;;  %v142_v27 = vpop.f32.mrf.mxu2 }
  0x8d   :  { %v151_v42 = vpop.f32.mrf.mxu3 }
  0x8e   :  { %98 = vmatpush.msra.mxu1 %v51_v19 }
  0x8f   :  { %442 = vmatmul.msk.f32.vlgmr.msra.gmra.mxu1 %vm70_vm3, %v438_v23 }
  0x94   :  { %v145_v29 = vpop.f32.mrf.mxu2 }
  0x97   :  { %443 = vmatmul.msk.f32.gmra.mxu1 %vm70_vm3, %v439_v24  ;;  %v453_v24 = vld [vmem:[%s614_s3 + $0x28] sm:$0xff] }
  0x98   :  { %257 = vperm.xlu2 %472, %v453_v24  }
  0x9c   :  { %v148_v35 = vpop.f32.mrf.mxu2 }
  0x9f   :  { %444 = vmatmul.msk.f32.gmra.mxu1 %vm70_vm3, %v440_v25 }
  0xa7   :  { %445 = vmatmul.msk.f32.gmra.mxu1 %vm70_vm3, %v441_v26 }
 0x10c   :  { %v100_v28 = vpop.f32.mrf.mxu1 }
 0x10d   :  { %v143_v37 = vadd.f32 %v142_v27, %v100_v28 }
 0x10f   :  { %v178_v43 = vadd.f32 %v161_v31, %v143_v37  ;;  %v460_v31 = vld [vmem:[%s614_s3 + $0x60] sm:$0x1] }
 0x110   :  { %423 = vperm.xlu2 %472, %v460_v31  }
 0x114   :  { %v103_v30 = vpop.f32.mrf.mxu1 }
 0x115   :  { %v146_v36 = vadd.f32 %v145_v29, %v103_v30 }
 0x117   :  { %v179_v41 = vadd.f32 %v166_v39, %v146_v36 }
 0x119   :  { %v182_v47 = vadd.f32 %v179_v41, %v178_v43 }
 0x11c   :  { %v106_v34 = vpop.f32.mrf.mxu1 }
 0x11d   :  { %v149_v38 = vadd.f32 %v148_v35, %v106_v34 }
 0x11f   :  { %v180_v44 = vadd.f32 %v171_v32, %v149_v38 }
 0x121   :  { %v183_v50 = vadd.f32 %v182_v47, %v180_v44 }
 0x124   :  { %v109_v45 = vpop.f32.mrf.mxu1 }
 0x125   :  { %v152_v48 = vadd.f32 %v151_v42, %v109_v45  ;;  %v451_v42 = vld [vmem:[%s612_s2 + $0x48] sm:$0xff] }
 0x127   :  { %v181_v51 = vadd.f32 %v176_v49, %v152_v48 }
 0x129   :  { %v184_v53 = vadd.f32 %v183_v50, %v181_v51 }
 0x12b   :  { %v185_v54 = vrot.slane %v184_v53, 4 }
 0x12d   :  { %v186_v56 = vadd.f32 %v185_v54, %v184_v53 }
 0x12f   :  { %v187_v57 = vrot.slane %v186_v56, 2 }
 0x131   :  { %v188_v59 = vadd.f32 %v187_v57, %v186_v56 }
 0x133   :  { %v189_v60 = vrot.slane %v188_v59, 1 }
 0x135   :  { %v190_v62 = vadd.f32 %v189_v60, %v188_v59 }
 0x137   :  { %v198_v63 = vmul.f32 %v197_v61, %v190_v62 }
 0x139   :  { %v199_v0 = vsub.f32 %v178_v43, %v198_v63  ;;  %v200_v1 = vsub.f32 %v179_v41, %v198_v63  ;;  %v201_v2 = vsub.f32 %v180_v44, %v198_v63  ;;  %v202_v3 = vsub.f32 %v181_v51, %v198_v63  ;;  %v253_v44 = vpop.permute.xlu2 %252 }
 0x13a   :  { %v489_v43 = vmov 16.0  }
 0x13b   :  { %v203_v4 = vmul.f32 %v199_v0, %v199_v0  ;;  %v204_v5 = vmul.f32 %v200_v1, %v200_v1  ;;  %v205_v6 = vmul.f32 %v201_v2, %v201_v2  ;;  %v206_v8 = vmul.f32 %v202_v3, %v202_v3 }
 0x13d   :  { %v207_v7 = vadd.f32 %v204_v5, %v203_v4 }
 0x13f   :  { %v208_v9 = vadd.f32 %v207_v7, %v205_v6 }
 0x141   :  { %v209_v10 = vadd.f32 %v208_v9, %v206_v8  ;;  %v258_v48 = vpop.permute.xlu2 %257 }
 0x143   :  { %v210_v11 = vrot.slane %v209_v10, 4 }
 0x145   :  { %v211_v12 = vadd.f32 %v210_v11, %v209_v10 }
 0x147   :  { %v212_v13 = vrot.slane %v211_v12, 2 }
 0x149   :  { %v213_v14 = vadd.f32 %v212_v13, %v211_v12 }
 0x14b   :  { %v214_v15 = vrot.slane %v213_v14, 1 }
 0x14d   :  { %v215_v16 = vadd.f32 %v214_v15, %v213_v14 }
 0x14f   :  { %v216_v17 = vmul.f32 %v215_v16, %v197_v61 }
 0x151   :  { %v217_v18 = vadd.f32 1e-05, %v216_v17 }
 0x153   :  { %476 = vrsqrt.f32 %v217_v18  ;;  %vm224_vm6 = vweird.f32 %v217_v18 }
 0x154   :  { %478 = vrcp.f32 %v489_v43 }
 0x159   :  { %v477_v19 = vpop.eup %476 }
 0x15a   :  { %v219_v21 = vmul.f32 %v477_v19, %v217_v18  ;;  %vm225_vm5 = vweird.f32 %v477_v19  ;;  %v479_v46 = vpop.eup %478 }
 0x15b   :  { %vm226_vm7 = vmor %vm224_vm6, %vm225_vm5  ;;  %v297_v47 = vmul.f32 16.0, %v479_v46  ;;  %vm301_vm12 = vweird.f32 %v479_v46 }
 0x15c   :  { %v220_v22 = vmul.f32 %v477_v19, %v219_v21 }
 0x15d   :  { %v298_v52 = vsub.f32 1.0, %v297_v47 }
 0x15e   :  { %v221_v23 = vmul.f32 0.5, %v220_v22 }
 0x15f   :  { %v299_v55 = vmul.f32 %v479_v46, %v298_v52 }
 0x160   :  { %v222_v25 = vsub.f32 1.5, %v221_v23 }
 0x161   :  { %v300_v58 = vadd.f32 %v479_v46, %v299_v55 }
 0x162   :  { %v223_v26 = vmul.f32 %v477_v19, %v222_v25  ;;  %v456_v25 = vld [vmem:[%s612_s2 + $0x60] sm:$0xff] }
 0x163   :  { %v302_v61 = vsel %vm301_vm12, %v479_v46, %v300_v58 }
 0x164   :  { %v227_v27 = vsel %vm226_vm7, %v477_v19, %v223_v26 }
 0x165   :  { %v231_v28 = vmul.f32 %v227_v27, %v202_v3  ;;  %v230_v29 = vmul.f32 %v227_v27, %v201_v2  ;;  %v229_v30 = vmul.f32 %v227_v27, %v200_v1  ;;  %v228_v34 = vmul.f32 %v227_v27, %v199_v0 }
 0x166   :  { %v490_v27 = vmov 8.0  }
 0x167   :  { %vm235_vm8 = vcmp.ge.f32.partialorder %v231_v28, 0.0  ;;  %v239_v32 = vmul.f32 0.2, %v231_v28  ;;  %v238_v33 = vmul.f32 0.2, %v230_v29  ;;  %vm234_vm9 = vcmp.ge.f32.partialorder %v230_v29, 0.0 }
 0x168   :  { %v237_v36 = vmul.f32 0.2, %v229_v30  ;;  %vm233_vm10 = vcmp.ge.f32.partialorder %v229_v30, 0.0  ;;  %v236_v38 = vmul.f32 0.2, %v228_v34  ;;  %vm232_vm11 = vcmp.ge.f32.partialorder %v228_v34, 0.0 }
 0x169   :  { %v243_v35 = vsel %vm235_vm8, %v231_v28, %v239_v32  ;;  %v242_v37 = vsel %vm234_vm9, %v230_v29, %v238_v33 }
 0x16a   :  { %278 = vmatpush.msrb.mxu3 %v243_v35  ;;  %v241_v39 = vsel %vm233_vm10, %v229_v30, %v237_v36  ;;  %v240_v41 = vsel %vm232_vm11, %v228_v34, %v236_v38  ;;  %v342_v30 = vpop.permute.xlu0 %341 }
 0x16c   :  { %279 = vmatpush.msrb.mxu3 %v242_v37 }
 0x16e   :  { %280 = vmatpush.msrb.mxu3 %v241_v39 }
 0x170   :  { %281 = vmatpush.msrb.mxu3 %v240_v41 }
 0x171   :  { %454 = vmatmul.msk.f32.vlgmr.msrb.gmra.mxu3 %vm112_vm2, %v450_v40 }
 0x179   :  { %455 = vmatmul.msk.f32.gmra.mxu3 %vm112_vm2, %v451_v42 }
 0x1f4   :  { %v283_v45 = vpop.f32.mrf.mxu3 }
 0x1f5   :  { %v284_v50 = vadd.f32 %v283_v45, %v253_v44 }
 0x1fc   :  { %v286_v49 = vpop.f32.mrf.mxu3 }
 0x1fd   :  { %v287_v51 = vadd.f32 %v286_v49, %v258_v48 }
 0x1ff   :  { %v289_v53 = vadd.f32 %v287_v51, %v284_v50 }
 0x201   :  { %v290_v54 = vrot.slane %v289_v53, 4 }
 0x203   :  { %v291_v56 = vadd.f32 %v290_v54, %v289_v53 }
 0x205   :  { %v292_v57 = vrot.slane %v291_v56, 2 }
 0x207   :  { %v293_v59 = vadd.f32 %v292_v57, %v291_v56 }
 0x209   :  { %v294_v60 = vrot.slane %v293_v59, 1 }
 0x20b   :  { %v295_v62 = vadd.f32 %v294_v60, %v293_v59 }
 0x20d   :  { %v303_v63 = vmul.f32 %v302_v61, %v295_v62 }
 0x20f   :  { %v304_v0 = vsub.f32 %v284_v50, %v303_v63  ;;  %v305_v1 = vsub.f32 %v287_v51, %v303_v63  ;;  %v412_v63 = vpop.permute.xlu1 %411 }
 0x211   :  { %v306_v2 = vmul.f32 %v304_v0, %v304_v0  ;;  %v307_v3 = vmul.f32 %v305_v1, %v305_v1 }
 0x213   :  { %v308_v4 = vadd.f32 %v307_v3, %v306_v2 }
 0x215   :  { %v309_v5 = vrot.slane %v308_v4, 4 }
 0x217   :  { %v310_v6 = vadd.f32 %v309_v5, %v308_v4 }
 0x219   :  { %v311_v7 = vrot.slane %v310_v6, 2 }
 0x21b   :  { %v312_v8 = vadd.f32 %v311_v7, %v310_v6 }
 0x21d   :  { %v313_v9 = vrot.slane %v312_v8, 1 }
 0x21f   :  { %v314_v10 = vadd.f32 %v313_v9, %v312_v8  ;;  %v424_v8 = vpop.permute.xlu2 %423 }
 0x221   :  { %v315_v11 = vmul.f32 %v314_v10, %v302_v61 }
 0x223   :  { %v316_v12 = vadd.f32 1e-05, %v315_v11 }
 0x225   :  { %480 = vrsqrt.f32 %v316_v12  ;;  %vm323_vm14 = vweird.f32 %v316_v12 }
 0x226   :  { %482 = vrcp.f32 %v490_v27 }
 0x22b   :  { %v481_v13 = vpop.eup %480 }
 0x22c   :  { %v318_v14 = vmul.f32 %v481_v13, %v316_v12  ;;  %vm324_vm13 = vweird.f32 %v481_v13  ;;  %v483_v28 = vpop.eup %482 }
 0x22d   :  { %vm325_vm15 = vmor %vm323_vm14, %vm324_vm13  ;;  %v374_v29 = vmul.f32 8.0, %v483_v28  ;;  %vm378_vm2 = vweird.f32 %v483_v28 }
 0x22e   :  { %v319_v15 = vmul.f32 %v481_v13, %v318_v14 }
 0x22f   :  { %v375_v32 = vsub.f32 1.0, %v374_v29 }
 0x230   :  { %v320_v16 = vmul.f32 0.5, %v319_v15 }
 0x231   :  { %v376_v35 = vmul.f32 %v483_v28, %v375_v32 }
 0x232   :  { %v321_v17 = vsub.f32 1.5, %v320_v16 }
 0x233   :  { %v377_v38 = vadd.f32 %v483_v28, %v376_v35 }
 0x234   :  { %v322_v18 = vmul.f32 %v481_v13, %v321_v17 }
 0x235   :  { %v379_v41 = vsel %vm378_vm2, %v483_v28, %v377_v38 }
 0x236   :  { %v326_v19 = vsel %vm325_vm15, %v481_v13, %v322_v18 }
 0x237   :  { %v328_v20 = vmul.f32 %v326_v19, %v305_v1  ;;  %v327_v21 = vmul.f32 %v326_v19, %v304_v0 }
 0x239   :  { %vm330_vm0 = vcmp.ge.f32.partialorder %v328_v20, 0.0  ;;  %v332_v22 = vmul.f32 0.2, %v328_v20  ;;  %v331_v23 = vmul.f32 0.2, %v327_v21  ;;  %vm329_vm1 = vcmp.ge.f32.partialorder %v327_v21, 0.0 }
 0x23b   :  { %v334_v24 = vsel %vm330_vm0, %v328_v20, %v332_v22  ;;  %v333_v26 = vsel %vm329_vm1, %v327_v21, %v331_v23 }
 0x23c   :  { %361 = vmatpush.msrb.mxu0 %v334_v24 }
 0x23e   :  { %362 = vmatpush.msrb.mxu0 %v333_v26 }
 0x23f   :  { %458 = vmatmul.msk.f32.vlgmr.msrb.gmra.mxu0 %vm70_vm3, %v456_v25 }
 0x2bc   :  { %v364_v31 = vpop.f32.mrf.mxu0 }
 0x2bd   :  { %v365_v33 = vadd.f32 %v364_v31, %v342_v30 }
 0x2bf   :  { %v367_v34 = vrot.slane %v365_v33, 4 }
 0x2c1   :  { %v368_v36 = vadd.f32 %v367_v34, %v365_v33 }
 0x2c3   :  { %v369_v37 = vrot.slane %v368_v36, 2 }
 0x2c5   :  { %v370_v39 = vadd.f32 %v369_v37, %v368_v36 }
 0x2c7   :  { %v371_v40 = vrot.slane %v370_v39, 1 }
 0x2c9   :  { %v372_v42 = vadd.f32 %v371_v40, %v370_v39 }
 0x2cb   :  { %v380_v43 = vmul.f32 %v379_v41, %v372_v42 }
 0x2cd   :  { %v381_v44 = vsub.f32 %v365_v33, %v380_v43 }
 0x2cf   :  { %v382_v45 = vmul.f32 %v381_v44, %v381_v44 }
 0x2d1   :  { %v383_v46 = vrot.slane %v382_v45, 4 }
 0x2d3   :  { %v384_v47 = vadd.f32 %v383_v46, %v382_v45 }
 0x2d5   :  { %v385_v48 = vrot.slane %v384_v47, 2 }
 0x2d7   :  { %v386_v49 = vadd.f32 %v385_v48, %v384_v47 }
 0x2d9   :  { %v387_v50 = vrot.slane %v386_v49, 1 }
 0x2db   :  { %v388_v51 = vadd.f32 %v387_v50, %v386_v49 }
 0x2dd   :  { %v389_v52 = vmul.f32 %v388_v51, %v379_v41 }
 0x2df   :  { %v390_v53 = vadd.f32 1e-05, %v389_v52 }
 0x2e1   :  { %484 = vrsqrt.f32 %v390_v53  ;;  %vm397_vm4 = vweird.f32 %v390_v53 }
 0x2e7   :  { %v485_v54 = vpop.eup %484 }
 0x2e8   :  { %v392_v55 = vmul.f32 %v485_v54, %v390_v53  ;;  %vm398_vm3 = vweird.f32 %v485_v54 }
 0x2e9   :  { %vm399_vm5 = vmor %vm397_vm4, %vm398_vm3 }
 0x2ea   :  { %v393_v56 = vmul.f32 %v485_v54, %v392_v55 }
 0x2ec   :  { %v394_v57 = vmul.f32 0.5, %v393_v56 }
 0x2ee   :  { %v395_v58 = vsub.f32 1.5, %v394_v57 }
 0x2f0   :  { %v396_v59 = vmul.f32 %v485_v54, %v395_v58 }
 0x2f2   :  { %v400_v60 = vsel %vm399_vm5, %v485_v54, %v396_v59 }
 0x2f3   :  { %v401_v61 = vmul.f32 %v400_v60, %v381_v44 }
 0x2f5   :  { %vm402_vm6 = vcmp.ge.f32.partialorder %v401_v61, 0.0  ;;  %v403_v62 = vmul.f32 0.2, %v401_v61 }
 0x2f7   :  { %v404_v0 = vsel %vm402_vm6, %v401_v61, %v403_v62 }
 0x2f8   :  { %v414_v1 = vmul.f32 %v412_v63, %v404_v0 }
 0x2fa   :  { %v415_v2 = vrot.slane %v414_v1, 4 }
 0x2fc   :  { %v416_v3 = vadd.f32 %v415_v2, %v414_v1 }
 0x2fe   :  { %v417_v4 = vrot.slane %v416_v3, 2 }
 0x300   :  { %v418_v5 = vadd.f32 %v417_v4, %v416_v3 }
 0x302   :  { %v419_v6 = vrot.slane %v418_v5, 1 }
 0x304   :  { %v420_v7 = vadd.f32 %v419_v6, %v418_v5 }
 0x306   :  { %v426_v9 = vadd.f32 %v424_v8, %v420_v7 }
 0x308   :  { %427 = vst [vmem:[%s615_s4] sm:$0x1] %v426_v9 }

</bundles_post_ra>
